<compile_context>
chip_gen: v5e
topology: v5e:2x2
jax: 0.10.0
libtpu: 0.0.40
codegen_flags: <defaults>
</compile_context>

<pallas_src>
import jax
import jax.numpy as jnp
from jax.experimental import pallas as pl
from jax.experimental.pallas import tpu as pltpu

_LANES = 128
_SUBLANES = 8


def _masked_l1_kernel(x_ref, t_ref, m_ref, loss_ref, msum_ref):
    i = pl.program_id(0)

    @pl.when(i == 0)
    def _():
        loss_ref[...] = jnp.zeros_like(loss_ref)
        msum_ref[...] = jnp.zeros_like(msum_ref)

    x = x_ref[...]
    t = t_ref[...]
    m = m_ref[...]

    # |input*mask - target*mask| in the native dtype on the VPU; widen to f32
    # only for accumulation (keeps vreg/VMEM pressure low for bf16 inputs).
    d = jnp.abs(x * m - t * m).astype(jnp.float32)
    mv = m.astype(jnp.float32)

    r = d.shape[0]
    # Split the leading (row) dim into (groups, 8 sublanes) -- preserves the
    # (8, 128) tile structure, so the reshape is layout-free and the reduction
    # over axis 0 is a chain of plain vreg adds on the VPU (no XLU traffic).
    d = d.reshape(r // _SUBLANES, _SUBLANES, _LANES)
    mv = mv.reshape(r // _SUBLANES, _SUBLANES, _LANES)

    loss_ref[...] += jnp.sum(d, axis=0)
    msum_ref[...] += jnp.sum(mv, axis=0)


def masked_l1_loss(input, target, mask, normalize_over_valid=False, tile_rows=2048):
    """Pallas implementation of MaskedL1Loss.forward(input, target, mask)."""
    assert input.shape == target.shape, (input.shape, target.shape)

    # mask.expand_as(input)
    mask_b = jnp.broadcast_to(mask, input.shape).astype(input.dtype)

    n = input.size
    x = input.reshape(-1)
    t = target.reshape(-1)
    m = mask_b.reshape(-1)

    # Lane-dense tiling of the flattened element stream.
    rows = pl.cdiv(n, _LANES)
    tile_rows = max(_SUBLANES, (int(tile_rows) // _SUBLANES) * _SUBLANES)
    tile_r = min(tile_rows, ((rows + _SUBLANES - 1) // _SUBLANES) * _SUBLANES)
    num_blocks = pl.cdiv(rows, tile_r)
    n_pad = num_blocks * tile_r * _LANES
    pad = n_pad - n
    if pad:
        x = jnp.pad(x, (0, pad))
        t = jnp.pad(t, (0, pad))
        m = jnp.pad(m, (0, pad))

    total_rows = num_blocks * tile_r
    x = x.reshape(total_rows, _LANES)
    t = t.reshape(total_rows, _LANES)
    m = m.reshape(total_rows, _LANES)

    in_spec = pl.BlockSpec((tile_r, _LANES), lambda i: (i, 0))
    out_spec = pl.BlockSpec((_SUBLANES, _LANES), lambda i: (0, 0))

    itemsize = jnp.dtype(input.dtype).itemsize
    cost = pl.CostEstimate(
        flops=6 * n_pad,
        transcendentals=0,
        bytes_accessed=3 * n_pad * itemsize + 2 * _SUBLANES * _LANES * 4,
    )

    loss_part, msum_part = pl.pallas_call(
        _masked_l1_kernel,
        out_shape=(
            jax.ShapeDtypeStruct((_SUBLANES, _LANES), jnp.float32),
            jax.ShapeDtypeStruct((_SUBLANES, _LANES), jnp.float32),
        ),
        grid_spec=pltpu.PrefetchScalarGridSpec(
            num_scalar_prefetch=0,
            grid=(num_blocks,),
            in_specs=[in_spec, in_spec, in_spec],
            out_specs=(out_spec, out_spec),
        ),
        compiler_params=pltpu.CompilerParams(
            dimension_semantics=("arbitrary",),
        ),
        cost_estimate=cost,
    )(x, t, m)

    # Single cross-lane reduction, outside the kernel (tiny (8,128) arrays).
    loss_sum = jnp.sum(loss_part)
    loss = loss_sum / jnp.float32(n)
    if normalize_over_valid:
        # numel(mask-expanded) == n, so mean * n / (sum+eps) == sum / (sum+eps).
        loss = loss_sum / (jnp.sum(msum_part) + jnp.float32(1e-6))
    return loss


def _masked_l1_ref(input, target, mask, normalize_over_valid=False):
    # Pure-JAX reference mirroring the PyTorch forward.
    mb = jnp.broadcast_to(mask, input.shape).astype(input.dtype)
    loss = jnp.mean(jnp.abs(input * mb - target * mb))
    if normalize_over_valid:
        loss = loss * mb.size / (jnp.sum(mb) + 1e-6)
    return loss


if __name__ == "__main__":
    key = jax.random.PRNGKey(0)
    k1, k2, k3, k4, k5, k6 = jax.random.split(key, 6)

    # Small shapes consistent with the module: B=2, C=4, H=W=16; mask broadcast
    # over channels (exercises expand_as semantics).
    x = jax.random.normal(k1, (2, 4, 16, 16), dtype=jnp.float32)
    t = jax.random.normal(k2, (2, 4, 16, 16), dtype=jnp.float32)
    m = (jax.random.uniform(k3, (2, 1, 16, 16)) > 0.5).astype(jnp.float32)

    out = jax.block_until_ready(masked_l1_loss(x, t, m))
    ref = _masked_l1_ref(x, t, m)
    assert jnp.allclose(out, ref, rtol=1e-5, atol=1e-5), (out, ref)

    # normalize_over_valid branch of the module.
    out_nv = jax.block_until_ready(masked_l1_loss(x, t, m, normalize_over_valid=True))
    ref_nv = _masked_l1_ref(x, t, m, normalize_over_valid=True)
    assert jnp.allclose(out_nv, ref_nv, rtol=1e-5, atol=1e-5), (out_nv, ref_nv)

    # Larger input exercising multiple grid steps + tail padding.
    x2 = jax.random.normal(k4, (2, 3, 96, 99), dtype=jnp.float32)
    t2 = jax.random.normal(k5, (2, 3, 96, 99), dtype=jnp.float32)
    m2 = (jax.random.uniform(k6, (2, 3, 96, 99)) > 0.3).astype(jnp.float32)
    out2 = jax.block_until_ready(masked_l1_loss(x2, t2, m2, tile_rows=64))
    ref2 = _masked_l1_ref(x2, t2, m2)
    assert jnp.allclose(out2, ref2, rtol=1e-5, atol=1e-5), (out2, ref2)

    # bf16 inputs (exercise the widen-for-accumulation path).
    xb = x.astype(jnp.bfloat16)
    tb = t.astype(jnp.bfloat16)
    mb = m.astype(jnp.bfloat16)
    out3 = jax.block_until_ready(masked_l1_loss(xb, tb, mb))
    ref3 = _masked_l1_ref(xb.astype(jnp.float32), tb.astype(jnp.float32),
                          mb.astype(jnp.float32))
    assert jnp.allclose(out3, ref3, rtol=2e-2, atol=2e-2), (out3, ref3)

    print("KERNEL_OK")
</pallas_src>

<mosaic_0001>
module attributes {stable_mosaic.version = 11 : i64} {
  func.func @_masked_l1_kernel(%arg0: i32, %arg1: memref<16x128xf32, #tpu.memory_space<vmem>>, %arg2: memref<16x128xf32, #tpu.memory_space<vmem>>, %arg3: memref<16x128xf32, #tpu.memory_space<vmem>>, %arg4: memref<8x128xf32, #tpu.memory_space<vmem>>, %arg5: memref<8x128xf32, #tpu.memory_space<vmem>>) attributes {dimension_semantics = [#tpu.dimension_semantics<arbitrary>], iteration_bounds = array<i64: 1>, scalar_prefetch = 0 : i64, scratch_operands = 0 : i64, tpu.core_type = #tpu.core_type<tc>, window_params = [{transform_indices = @transform_0, window_bounds = array<i64: 16, 128>}, {transform_indices = @transform_1, window_bounds = array<i64: 16, 128>}, {transform_indices = @transform_2, window_bounds = array<i64: 16, 128>}, {pipeline_mode = #tpu.pipeline_mode<synchronous>, transform_indices = @transform_3, window_bounds = array<i64: 8, 128>}, {pipeline_mode = #tpu.pipeline_mode<synchronous>, transform_indices = @transform_4, window_bounds = array<i64: 8, 128>}]} {
    %c0_i32 = arith.constant 0 : i32
    %0 = arith.cmpi eq, %arg0, %c0_i32 : i32
    %1 = arith.extui %0 : i1 to i32
    %c0_i32_0 = arith.constant 0 : i32
    %2 = arith.cmpi ne, %1, %c0_i32_0 : i32
    scf.if %2 {
      %cst_15 = arith.constant 0.000000e+00 : f32
      %20 = vector.broadcast %cst_15 : f32 to vector<8x128xf32>
      %c0_16 = arith.constant 0 : index
      %c0_17 = arith.constant 0 : index
      %21 = vector.load %arg4[%c0_16, %c0_17] : memref<8x128xf32, #tpu.memory_space<vmem>>, vector<8x128xf32>
      tpu.vector_store %arg4[%c0_16, %c0_17], %20 {strides = array<i32>} : memref<8x128xf32, #tpu.memory_space<vmem>>, vector<8x128xf32>,
      %cst_18 = arith.constant 0.000000e+00 : f32
      %22 = vector.broadcast %cst_18 : f32 to vector<8x128xf32>
      %c0_19 = arith.constant 0 : index
      %c0_20 = arith.constant 0 : index
      %23 = vector.load %arg5[%c0_19, %c0_20] : memref<8x128xf32, #tpu.memory_space<vmem>>, vector<8x128xf32>
      tpu.vector_store %arg5[%c0_19, %c0_20], %22 {strides = array<i32>} : memref<8x128xf32, #tpu.memory_space<vmem>>, vector<8x128xf32>,
    } else {
    }
    %c0 = arith.constant 0 : index
    %c0_1 = arith.constant 0 : index
    %3 = vector.load %arg1[%c0, %c0_1] : memref<16x128xf32, #tpu.memory_space<vmem>>, vector<16x128xf32>
    %c0_2 = arith.constant 0 : index
    %c0_3 = arith.constant 0 : index
    %4 = vector.load %arg2[%c0_2, %c0_3] : memref<16x128xf32, #tpu.memory_space<vmem>>, vector<16x128xf32>
    %c0_4 = arith.constant 0 : index
    %c0_5 = arith.constant 0 : index
    %5 = vector.load %arg3[%c0_4, %c0_5] : memref<16x128xf32, #tpu.memory_space<vmem>>, vector<16x128xf32>
    %6 = arith.mulf %3, %5 : vector<16x128xf32>
    %7 = arith.mulf %4, %5 : vector<16x128xf32>
    %8 = arith.subf %6, %7 : vector<16x128xf32>
    %9 = math.absf %8 : vector<16x128xf32>
    %10 = vector.shape_cast %9 : vector<16x128xf32> to vector<2x8x128xf32>
    %11 = vector.shape_cast %5 : vector<16x128xf32> to vector<2x8x128xf32>
    %c0_6 = arith.constant 0 : index
    %c0_7 = arith.constant 0 : index
    %12 = vector.load %arg4[%c0_6, %c0_7] : memref<8x128xf32, #tpu.memory_space<vmem>>, vector<8x128xf32>
    %cst = arith.constant dense<0.000000e+00> : vector<8x128xf32>
    %13 = vector.multi_reduction <add>, %10, %cst [0] : vector<2x8x128xf32> to vector<8x128xf32>
    %14 = arith.addf %12, %13 : vector<8x128xf32>
    %c0_8 = arith.constant 0 : index
    %c0_9 = arith.constant 0 : index
    %15 = vector.load %arg4[%c0_8, %c0_9] : memref<8x128xf32, #tpu.memory_space<vmem>>, vector<8x128xf32>
    tpu.vector_store %arg4[%c0_8, %c0_9], %14 {strides = array<i32>} : memref<8x128xf32, #tpu.memory_space<vmem>>, vector<8x128xf32>,
    %c0_10 = arith.constant 0 : index
    %c0_11 = arith.constant 0 : index
    %16 = vector.load %arg5[%c0_10, %c0_11] : memref<8x128xf32, #tpu.memory_space<vmem>>, vector<8x128xf32>
    %cst_12 = arith.constant dense<0.000000e+00> : vector<8x128xf32>
    %17 = vector.multi_reduction <add>, %11, %cst_12 [0] : vector<2x8x128xf32> to vector<8x128xf32>
    %18 = arith.addf %16, %17 : vector<8x128xf32>
    %c0_13 = arith.constant 0 : index
    %c0_14 = arith.constant 0 : index
    %19 = vector.load %arg5[%c0_13, %c0_14] : memref<8x128xf32, #tpu.memory_space<vmem>>, vector<8x128xf32>
    tpu.vector_store %arg5[%c0_13, %c0_14], %18 {strides = array<i32>} : memref<8x128xf32, #tpu.memory_space<vmem>>, vector<8x128xf32>,
    return
  }
  func.func @transform_0(%arg0: i32) -> (i32, i32) {
    %c0_i32 = arith.constant 0 : i32
    %c0_i32_0 = arith.constant 0 : i32
    return %arg0, %c0_i32 : i32, i32
  }
  func.func @transform_1(%arg0: i32) -> (i32, i32) {
    %c0_i32 = arith.constant 0 : i32
    %c0_i32_0 = arith.constant 0 : i32
    return %arg0, %c0_i32 : i32, i32
  }
  func.func @transform_2(%arg0: i32) -> (i32, i32) {
    %c0_i32 = arith.constant 0 : i32
    %c0_i32_0 = arith.constant 0 : i32
    return %arg0, %c0_i32 : i32, i32
  }
  func.func @transform_3(%arg0: i32) -> (i32, i32) {
    %c0_i32 = arith.constant 0 : i32
    %c0_i32_0 = arith.constant 0 : i32
    %c0_i32_1 = arith.constant 0 : i32
    return %c0_i32, %c0_i32_0 : i32, i32
  }
  func.func @transform_4(%arg0: i32) -> (i32, i32) {
    %c0_i32 = arith.constant 0 : i32
    %c0_i32_0 = arith.constant 0 : i32
    %c0_i32_1 = arith.constant 0 : i32
    return %c0_i32, %c0_i32_0 : i32, i32
  }
}

</mosaic_0001>

<bundles_post_ra>
// kernel: tpu_custom_call.1
= control target key start
LH: loop header
LB: loop body
LE: loop exit
PB: predicated region body
PF: predicated region fallthrough
CT: control target
= control target key end

     0   :  { %10 = vsyncpa [#allocation3], 0  ;;  %s310_s0 = inlined_call_operand.hbm [shape: f32[16,128], index: 0, kind: input, shape index: {}]   ;;  %s311_s1 = inlined_call_operand.hbm [shape: f32[16,128], index: 1, kind: input, shape index: {}]   ;;  %s312_s2 = inlined_call_operand.hbm [shape: f32[16,128], index: 2, kind: input, shape index: {}]   ;;  %s313_s3 = inlined_call_operand.hbm [shape: f32[8,128], index: 3, kind: output, shape index: {0}]   ;;  %s314_s4 = inlined_call_operand.hbm [shape: f32[8,128], index: 4, kind: output, shape index: {1}]  }
   0x1   :  { %11 = vsyncpa [#allocation6], 0 }
   0x2   :  { %12 = vsyncpa [#allocation4], 0 }
   0x3   :  { %13 = vsyncpa [#allocation10], 0  ;;  %s31_s17 = sshll.u32 %s311_s1, 4  ;;  %s263_s18 = smov [#allocation5]   ;;  %s32_s17 = int_to_ptr.hbm [resolvable:$true] %s31_s17 }
   0x4   :  { %s33_s19 = sshll.u32 %s263_s18, 4  ;;  %s18_s22 = sshll.u32 %s310_s0, 4  ;;  %s34_s19 = int_to_ptr.vmem [resolvable:$true] %s33_s19  ;;  %s19_s22 = int_to_ptr.hbm [resolvable:$true] %s18_s22 }
   0x5   :  { %s264_s23 = smov 128   ;;  %s265_s24 = smov 8  }
   0x6   :  { %39 = dma.hbm_to_vmem [thread:$0]  %s32_s17, 256, %s34_s19, [#allocation6], %s264_s23, %s264_s23, %s265_s24  }
   0x7   :  { %s266_s25 = smov [#allocation2]   ;;  %s44_s29 = sshll.u32 %s312_s2, 4  ;;  %s45_s29 = int_to_ptr.hbm [resolvable:$true] %s44_s29 }
   0x8   :  { %s20_s26 = sshll.u32 %s266_s25, 4  ;;  %s267_s1 = smov [#allocation7]   ;;  %s21_s26 = int_to_ptr.vmem [resolvable:$true] %s20_s26 }
   0x9   :  { %26 = dma.hbm_to_vmem [thread:$0]  %s19_s22, 256, %s21_s26, [#allocation3], %s264_s23, %s264_s23, %s265_s24  }
   0xa   :  { %s46_s30 = sshll.u32 %s267_s1, 4  ;;  %s47_s30 = int_to_ptr.vmem [resolvable:$true] %s46_s30 }
   0xb   :  { %52 = dma.hbm_to_vmem [thread:$0]  %s45_s29, 256, %s47_s30, [#allocation6], %s264_s23, %s264_s23, %s265_s24  }
   0xc   :  { %255 = dma.done.wait [#allocation3], 256  }
   0xd   :  { %256 = vsyncadd [#allocation3], 4294967040 }
   0xe   :  { %257 = dma.done.wait [#allocation6], 512  }
   0xf   :  { %258 = vsyncadd [#allocation6], 4294966784  ;;  %v71_v0 = vld [vmem:[#allocation2] sm:$0xff]  ;;  %v72_v1 = vld [vmem:[#allocation2 + $0x8] sm:$0xff]  ;;  %s268_s0 = smov [#allocation9]   ;;  %s111_s7 = sshll.u32 %s314_s4, 4  ;;  %s112_s7 = int_to_ptr.hbm [resolvable:$true] %s111_s7 }
  0x10   :  { %v73_v2 = vld [vmem:[#allocation5] sm:$0xff]  ;;  %v74_v3 = vld [vmem:[#allocation5 + $0x8] sm:$0xff]  ;;  %v75_v4 = vld [vmem:[#allocation7] sm:$0xff]  ;;  %s109_s2 = sshll.u32 %s268_s0, 4  ;;  %s269_s8 = smov [#allocation8]   ;;  %s110_s2 = int_to_ptr.vmem [resolvable:$true] %s109_s2 }
  0x11   :  { %v76_v5 = vld [vmem:[#allocation7 + $0x8] sm:$0xff]  ;;  %v77_v6 = vmul.f32 %v75_v4, %v71_v0  ;;  %v79_v8 = vmul.f32 %v75_v4, %v73_v2  ;;  %s98_s9 = sshll.u32 %s269_s8, 4  ;;  %s100_s12 = sshll.u32 %s313_s3, 4  ;;  %s99_s9 = int_to_ptr.vmem [resolvable:$true] %s98_s9  ;;  %s101_s12 = int_to_ptr.hbm [resolvable:$true] %s100_s12 }
  0x12   :  { %v78_v7 = vmul.f32 %v76_v5, %v72_v1  ;;  %v80_v9 = vmul.f32 %v76_v5, %v74_v3  ;;  %v90_v10 = vadd.f32 %v76_v5, %v75_v4 }
  0x13   :  { %v81_v11 = vsub.f32 %v77_v6, %v79_v8 }
  0x14   :  { %v82_v12 = vsub.f32 %v78_v7, %v80_v9  ;;  %92 = vst [vmem:[#allocation9] sm:$0xff] %v90_v10 }
  0x15   :  { %v83_v13 = vand.u32 2147483647, %v81_v11  ;;  %114 = dma.vmem_to_hbm [thread:$0]  %s110_s2, 128, %s112_s7, [#allocation10]  }
  0x16   :  { %v84_v14 = vand.u32 2147483647, %v82_v12 }
  0x18   :  { %v86_v15 = vadd.f32 %v84_v14, %v83_v13 }
  0x1a   :  { %88 = vst [vmem:[#allocation8] sm:$0xff] %v86_v15 }
  0x1b   :  { %103 = dma.vmem_to_hbm [thread:$0]  %s99_s9, 128, %s101_s12, [#allocation4]  }
  0x1c   :  { %259 = dma.done.wait [#allocation4], 128  }
  0x1d   :  { %260 = vsyncadd [#allocation4], 4294967168 }
  0x1e   :  { %261 = dma.done.wait [#allocation10], 128  }
  0x1f   :  { %262 = vsyncadd [#allocation10], 4294967168 }
  0x20   :  { %123 = vsyncpa [#allocation3], 1 }
  0x21   :  { %124 = vsyncpa [#allocation6], 1 }
  0x22   :  { %125 = vsyncpa [#allocation4], 1 }
  0x23   :  { %126 = vsyncpa [#allocation10], 1 }

</bundles_post_ra>
